<compile_context>
chip_gen: v7x
topology: tpu7x:2x2x1
jax: 0.10.0
libtpu: 0.0.40
codegen_flags: <defaults>
</compile_context>

<pallas_src>
import jax
import jax.numpy as jnp
from jax import lax
from jax.experimental import pallas as pl
from jax.experimental.pallas import tpu as pltpu

BN_EPS = 1e-5
LANE = 128


def _round_up(x, m):
    return ((x + m - 1) // m) * m


def _pick_band(h, row_width, max_rows):
    """Largest divisor th of h with th*row_width <= max_rows (falls back to 1)."""
    best = 1
    for th in range(1, h + 1):
        if h % th == 0 and th * row_width <= max_rows:
            best = th
    return best


def conv_bn_relu_pallas(x_nchw, weight_oihw, gamma, beta, *,
                        ks=3, stride=1, padding=1,
                        max_rows_conv=1024, max_rows_bn=2048):
    assert stride == 1 and ks == 3 and padding == 1, "fixed to ks=3, s=1, p=1"
    n, cin, h, w = x_nchw.shape
    cout = weight_oihw.shape[0]

    wp = _round_up(w, 8)                 # flattened row width (extra cols are exact zeros)
    k3 = 3 * cin                         # horizontal taps folded into the channel dim
    cp = _round_up(cout, LANE) if cout >= LANE else cout   # review #6: no 128-pad for small Cout
    hp = h + 2                           # height-padded rows
    p_in = hp * wp                       # flattened padded-input rows per image
    m_img = h * wp                       # flattened output rows per image
    m_valid = float(n * h * w)           # true element count per channel for BN stats

    # ---- glue: NCHW -> NHWC (bf16), 3x width-shift, pad, flatten ----------------------
    # TODO(synk): keep activations NHWC end-to-end if the surrounding graph allows,
    # dropping both transposes (each is a full HBM round trip of the activation).
    x_nhwc = jnp.transpose(x_nchw, (0, 2, 3, 1)).astype(jnp.bfloat16)
    xpad = jnp.pad(x_nhwc, ((0, 0), (1, 1), (1, 1), (0, 0)))            # (N, H+2, W+2, Cin)
    xcol = jnp.concatenate([xpad[:, :, dw:dw + w, :] for dw in range(3)], axis=-1)
    if wp != w:                                                          # zero cols -> conv out exactly 0
        xcol = jnp.pad(xcol, ((0, 0), (0, 0), (0, wp - w), (0, 0)))
    xflat = xcol.reshape(n, p_in, k3)                                    # (N, (H+2)*Wp, 3*Cin)

    # weight (O, I, kh, kw) -> w3[dh, dw*Cin + c, o] = weight[o, c, dh, dw], pad Cout, bf16
    w3 = jnp.transpose(weight_oihw, (2, 3, 1, 0)).reshape(3, k3, cout)
    w3 = jnp.pad(w3, ((0, 0), (0, 0), (0, cp - cout))).astype(jnp.bfloat16)

    # ---- pass 1: fused vertical-tap conv (MXU, f32 acc) + per-band BN partials --------
    th1 = _pick_band(h, wp, max_rows_conv)
    rows1 = th1 * wp
    nb1 = h // th1
    count_b = float(th1 * w)                      # valid elements per band per channel
    inv_count_b = 1.0 / count_b

    def conv_stats_kernel(x_ref, w_ref, y_ref, part_ref):
        i = pl.program_id(1)
        acc = jnp.zeros((rows1, cp), jnp.float32)
        for dh in range(3):                       # 3 vertical taps, aligned row shifts
            start = pl.multiple_of(i * rows1 + dh * wp, 8)
            lhs = x_ref[0, pl.ds(start, rows1), :]                       # (rows1, 3*Cin) bf16
            acc = acc + jnp.dot(lhs, w_ref[dh], preferred_element_type=jnp.float32)
        y_ref[0] = acc.astype(y_ref.dtype)                               # bf16 writeback (review #2)
        # BN partials from the f32 accumulator: per-band sum and mean-centred sumsq.
        s = jnp.sum(acc, axis=0, keepdims=True)                          # (1, cp)
        mu = s * inv_count_b
        q = jnp.sum((acc - mu) * (acc - mu), axis=0, keepdims=True)      # (1, cp)
        part_ref[0, 0] = jnp.concatenate([s, q], axis=0)                 # single store (review #8)

    cost1 = pl.CostEstimate(
        flops=2 * 3 * n * m_img * k3 * cp + 6 * n * m_img * cp,
        transcendentals=0,
        bytes_accessed=n * p_in * k3 * 2 + 3 * k3 * cp * 2
                       + n * m_img * cp * 2 + n * nb1 * 2 * cp * 4)

    y_flat, partials = pl.pallas_call(
        conv_stats_kernel,
        out_shape=(jax.ShapeDtypeStruct((n, h * wp, cp), jnp.bfloat16),
                   jax.ShapeDtypeStruct((n, nb1, 2, cp), jnp.float32)),
        grid=(n, nb1),
        in_specs=[pl.BlockSpec((1, p_in, k3), lambda b, i: (b, 0, 0)),   # resident per image
                  pl.BlockSpec((3, k3, cp), lambda b, i: (0, 0, 0))],
        out_specs=(pl.BlockSpec((1, rows1, cp), lambda b, i: (b, i, 0)),
                   pl.BlockSpec((1, 1, 2, cp), lambda b, i: (b, i, 0, 0))),
        compiler_params=pltpu.CompilerParams(
            dimension_semantics=("parallel", "parallel")),
        cost_estimate=cost1,
    )(xflat, w3)

    # ---- global BN stats (tiny XLA reduce, pooled-variance combination) --------------
    # TODO(synk): BatchNorm2d running_mean/running_var momentum updates (training-mode
    # buffer side effect) are not produced; only the forward activations are returned.
    s_b = partials[:, :, 0, :].reshape(n * nb1, cp)
    q_b = partials[:, :, 1, :].reshape(n * nb1, cp)
    mu_b = s_b * inv_count_b                      # same rounding as the in-kernel mu
    pad_per_band = float(th1 * (wp - w))          # exactly-zero padded elements per band
    q_b = q_b - pad_per_band * mu_b * mu_b        # remove (0 - mu)^2 of the padded cols
    mean = jnp.sum(s_b, axis=0) / m_valid
    var = (jnp.sum(q_b, axis=0)
           + count_b * jnp.sum((mu_b - mean) ** 2, axis=0)) / m_valid
    var = jnp.maximum(var, 0.0)
    inv_std = lax.rsqrt(var + BN_EPS)
    gamma_p = jnp.pad(gamma.astype(jnp.float32), (0, cp - cout))
    beta_p = jnp.pad(beta.astype(jnp.float32), (0, cp - cout))
    scale = gamma_p * inv_std
    shift = beta_p - mean * scale
    ss = jnp.stack([scale, shift], axis=0)        # (2, cp)

    # ---- pass 2: affine + ReLU (HBM-bound, larger tiles per review #3) ----------------
    th2 = _pick_band(h, wp, max_rows_bn)
    rows2 = th2 * wp
    nb2 = h // th2

    def bn_relu_kernel(y_ref, ss_ref, o_ref):
        yv = y_ref[0].astype(jnp.float32)
        o_ref[0] = jnp.maximum(yv * ss_ref[0:1, :] + ss_ref[1:2, :], 0.0).astype(o_ref.dtype)

    cost2 = pl.CostEstimate(flops=3 * n * m_img * cp, transcendentals=0,
                            bytes_accessed=n * m_img * cp * (2 + 4) + 2 * cp * 4)
    out_flat = pl.pallas_call(
        bn_relu_kernel,
        out_shape=jax.ShapeDtypeStruct((n, h * wp, cp), jnp.float32),
        grid=(n, nb2),
        in_specs=[pl.BlockSpec((1, rows2, cp), lambda b, j: (b, j, 0)),
                  pl.BlockSpec((2, cp), lambda b, j: (0, 0))],
        out_specs=pl.BlockSpec((1, rows2, cp), lambda b, j: (b, j, 0)),
        compiler_params=pltpu.CompilerParams(
            dimension_semantics=("parallel", "parallel")),
        cost_estimate=cost2,
    )(y_flat, ss)

    # ---- glue: crop width/channel padding, back to NCHW ------------------------------
    out = out_flat.reshape(n, h, wp, cp)[:, :, :w, :cout]
    return jnp.transpose(out, (0, 3, 1, 2))


def init_params(key, in_chan, out_chan, ks=3):
    # Conv: kaiming_normal_(a=1) => gain = sqrt(2/(1+a^2)) = 1, fan_in = in_chan*ks*ks
    fan_in = in_chan * ks * ks
    std = 1.0 / jnp.sqrt(float(fan_in))
    weight = jax.random.normal(key, (out_chan, in_chan, ks, ks), dtype=jnp.float32) * std
    # BatchNorm2d defaults: gamma=1, beta=0
    gamma = jnp.ones((out_chan,), dtype=jnp.float32)
    beta = jnp.zeros((out_chan,), dtype=jnp.float32)
    return weight, gamma, beta


if __name__ == "__main__":
    key = jax.random.PRNGKey(0)
    k_x, k_w = jax.random.split(key)

    N, Cin, H, W = 2, 4, 16, 16
    Cout = 8

    x = jax.random.normal(k_x, (N, Cin, H, W), dtype=jnp.float32)
    weight, gamma, beta = init_params(k_w, Cin, Cout, ks=3)

    fwd = jax.jit(conv_bn_relu_pallas)
    out = jax.block_until_ready(fwd(x, weight, gamma, beta))

    # Reference (mirrors kernel numerics: bf16 conv inputs, f32 accumulation, BN stats
    # from the f32 conv, stored-y bf16 rounding applied before the affine + ReLU).
    ref_conv = lax.conv_general_dilated(
        x.astype(jnp.bfloat16), weight.astype(jnp.bfloat16),
        window_strides=(1, 1), padding=((1, 1), (1, 1)),
        dimension_numbers=("NCHW", "OIHW", "NCHW"),
        preferred_element_type=jnp.float32)
    mean = jnp.mean(ref_conv, axis=(0, 2, 3), keepdims=True)
    var = jnp.mean((ref_conv - mean) ** 2, axis=(0, 2, 3), keepdims=True)
    y_q = ref_conv.astype(jnp.bfloat16).astype(jnp.float32)
    ref = jnp.maximum((y_q - mean) * lax.rsqrt(var + BN_EPS)
                      * gamma.reshape(1, -1, 1, 1) + beta.reshape(1, -1, 1, 1), 0.0)

    assert out.shape == (N, Cout, H, W)
    err = float(jnp.max(jnp.abs(out - ref)))
    assert err < 2e-2, f"max abs err {err}"

    print("KERNEL_OK")
</pallas_src>

<mosaic_0001>
module attributes {stable_mosaic.version = 11 : i64} {
  func.func @conv_stats_kernel(%arg0: i32, %arg1: i32, %arg2: memref<1x288x12xbf16, #tpu.memory_space<vmem>>, %arg3: memref<3x12x8xbf16, #tpu.memory_space<vmem>>, %arg4: memref<1x256x8xbf16, #tpu.memory_space<vmem>>, %arg5: memref<1x1x2x8xf32, #tpu.memory_space<vmem>>) attributes {dimension_semantics = [#tpu.dimension_semantics<parallel>, #tpu.dimension_semantics<parallel>], iteration_bounds = array<i64: 2, 1>, scalar_prefetch = 0 : i64, scratch_operands = 0 : i64, tpu.core_type = #tpu.core_type<tc>, window_params = [{transform_indices = @transform_0, window_bounds = array<i64: 1, 288, 12>}, {pipeline_mode = #tpu.pipeline_mode<synchronous>, transform_indices = @transform_1, window_bounds = array<i64: 3, 12, 8>}, {transform_indices = @transform_2, window_bounds = array<i64: 1, 256, 8>}, {transform_indices = @transform_3, window_bounds = array<i64: 1, 1, 2, 8>}]} {
    %cst = arith.constant 0.000000e+00 : f32
    %0 = vector.broadcast %cst : f32 to vector<256x8xf32>
    %c256_i32 = arith.constant 256 : i32
    %1 = arith.muli %arg1, %c256_i32 : i32
    %c0_i32 = arith.constant 0 : i32
    %2 = arith.addi %1, %c0_i32 : i32
    %3 = tpu.assume_multiple %2, 8 : i32
    %c0 = arith.constant 0 : index
    %4 = arith.index_cast %3 : i32 to index
    %c0_0 = arith.constant 0 : index
    %5 = vector.load %arg2[%c0, %4, %c0_0] : memref<1x288x12xbf16, #tpu.memory_space<vmem>>, vector<1x256x12xbf16>
    %6 = vector.shape_cast %5 : vector<1x256x12xbf16> to vector<256x12xbf16>
    %c0_1 = arith.constant 0 : index
    %c0_2 = arith.constant 0 : index
    %c0_3 = arith.constant 0 : index
    %7 = vector.load %arg3[%c0_1, %c0_2, %c0_3] : memref<3x12x8xbf16, #tpu.memory_space<vmem>>, vector<1x12x8xbf16>
    %8 = vector.shape_cast %7 : vector<1x12x8xbf16> to vector<12x8xbf16>
    %cst_4 = arith.constant dense<0.000000e+00> : vector<256x8xf32>
    %9 = tpu.matmul %6, %8, %cst_4 {dimension_numbers = #tpu.dot_dimension_numbers<[1], [0], [0], [1], [0, 0, 1, 1], [], []>} : vector<256x12xbf16>, vector<12x8xbf16>, vector<256x8xf32> -> vector<256x8xf32>
    %10 = arith.addf %0, %9 : vector<256x8xf32>
    %c256_i32_5 = arith.constant 256 : i32
    %11 = arith.muli %arg1, %c256_i32_5 : i32
    %c16_i32 = arith.constant 16 : i32
    %12 = arith.addi %11, %c16_i32 : i32
    %13 = tpu.assume_multiple %12, 8 : i32
    %c0_6 = arith.constant 0 : index
    %14 = arith.index_cast %13 : i32 to index
    %c0_7 = arith.constant 0 : index
    %15 = vector.load %arg2[%c0_6, %14, %c0_7] : memref<1x288x12xbf16, #tpu.memory_space<vmem>>, vector<1x256x12xbf16>
    %16 = vector.shape_cast %15 : vector<1x256x12xbf16> to vector<256x12xbf16>
    %c1 = arith.constant 1 : index
    %c0_8 = arith.constant 0 : index
    %c0_9 = arith.constant 0 : index
    %17 = vector.load %arg3[%c1, %c0_8, %c0_9] : memref<3x12x8xbf16, #tpu.memory_space<vmem>>, vector<1x12x8xbf16>
    %18 = vector.shape_cast %17 : vector<1x12x8xbf16> to vector<12x8xbf16>
    %cst_10 = arith.constant dense<0.000000e+00> : vector<256x8xf32>
    %19 = tpu.matmul %16, %18, %cst_10 {dimension_numbers = #tpu.dot_dimension_numbers<[1], [0], [0], [1], [0, 0, 1, 1], [], []>} : vector<256x12xbf16>, vector<12x8xbf16>, vector<256x8xf32> -> vector<256x8xf32>
    %20 = arith.addf %10, %19 : vector<256x8xf32>
    %c256_i32_11 = arith.constant 256 : i32
    %21 = arith.muli %arg1, %c256_i32_11 : i32
    %c32_i32 = arith.constant 32 : i32
    %22 = arith.addi %21, %c32_i32 : i32
    %23 = tpu.assume_multiple %22, 8 : i32
    %c0_12 = arith.constant 0 : index
    %24 = arith.index_cast %23 : i32 to index
    %c0_13 = arith.constant 0 : index
    %25 = vector.load %arg2[%c0_12, %24, %c0_13] : memref<1x288x12xbf16, #tpu.memory_space<vmem>>, vector<1x256x12xbf16>
    %26 = vector.shape_cast %25 : vector<1x256x12xbf16> to vector<256x12xbf16>
    %c2 = arith.constant 2 : index
    %c0_14 = arith.constant 0 : index
    %c0_15 = arith.constant 0 : index
    %27 = vector.load %arg3[%c2, %c0_14, %c0_15] : memref<3x12x8xbf16, #tpu.memory_space<vmem>>, vector<1x12x8xbf16>
    %28 = vector.shape_cast %27 : vector<1x12x8xbf16> to vector<12x8xbf16>
    %cst_16 = arith.constant dense<0.000000e+00> : vector<256x8xf32>
    %29 = tpu.matmul %26, %28, %cst_16 {dimension_numbers = #tpu.dot_dimension_numbers<[1], [0], [0], [1], [0, 0, 1, 1], [], []>} : vector<256x12xbf16>, vector<12x8xbf16>, vector<256x8xf32> -> vector<256x8xf32>
    %30 = arith.addf %20, %29 : vector<256x8xf32>
    %31 = arith.truncf %30 : vector<256x8xf32> to vector<256x8xbf16>
    %c0_17 = arith.constant 0 : index
    %c0_18 = arith.constant 0 : index
    %c0_19 = arith.constant 0 : index
    %32 = vector.load %arg4[%c0_17, %c0_18, %c0_19] : memref<1x256x8xbf16, #tpu.memory_space<vmem>>, vector<1x256x8xbf16>
    %33 = vector.shape_cast %32 : vector<1x256x8xbf16> to vector<256x8xbf16>
    %34 = vector.shape_cast %31 : vector<256x8xbf16> to vector<1x256x8xbf16>
    tpu.vector_store %arg4[%c0_17, %c0_18, %c0_19], %34 {strides = array<i32>} : memref<1x256x8xbf16, #tpu.memory_space<vmem>>, vector<1x256x8xbf16>,
    %cst_20 = arith.constant dense<0.000000e+00> : vector<8xf32>
    %35 = vector.multi_reduction <add>, %30, %cst_20 [0] : vector<256x8xf32> to vector<8xf32>
    %36 = vector.shape_cast %35 : vector<8xf32> to vector<1x8xf32>
    %cst_21 = arith.constant 3.906250e-03 : f32
    %37 = vector.broadcast %cst_21 : f32 to vector<1x8xf32>
    %38 = arith.mulf %36, %37 : vector<1x8xf32>
    %39 = vector.broadcast %38 : vector<1x8xf32> to vector<256x8xf32>
    %40 = arith.subf %30, %39 : vector<256x8xf32>
    %41 = vector.broadcast %38 : vector<1x8xf32> to vector<256x8xf32>
    %42 = arith.subf %30, %41 : vector<256x8xf32>
    %43 = arith.mulf %40, %42 : vector<256x8xf32>
    %cst_22 = arith.constant dense<0.000000e+00> : vector<8xf32>
    %44 = vector.multi_reduction <add>, %43, %cst_22 [0] : vector<256x8xf32> to vector<8xf32>
    %45 = vector.shape_cast %44 : vector<8xf32> to vector<1x8xf32>
    %46 = tpu.concatenate %36, %45 in 0 : vector<1x8xf32>, vector<1x8xf32> -> vector<2x8xf32>
    %c0_23 = arith.constant 0 : index
    %c0_24 = arith.constant 0 : index
    %c0_25 = arith.constant 0 : index
    %c0_26 = arith.constant 0 : index
    %47 = vector.load %arg5[%c0_23, %c0_24, %c0_25, %c0_26] : memref<1x1x2x8xf32, #tpu.memory_space<vmem>>, vector<1x1x2x8xf32>
    %48 = vector.shape_cast %47 : vector<1x1x2x8xf32> to vector<2x8xf32>
    %49 = vector.shape_cast %46 : vector<2x8xf32> to vector<1x1x2x8xf32>
    tpu.vector_store %arg5[%c0_23, %c0_24, %c0_25, %c0_26], %49 {strides = array<i32>} : memref<1x1x2x8xf32, #tpu.memory_space<vmem>>, vector<1x1x2x8xf32>,
    return
  }
  func.func @transform_0(%arg0: i32, %arg1: i32) -> (i32, i32, i32) {
    %c0_i32 = arith.constant 0 : i32
    %c0_i32_0 = arith.constant 0 : i32
    %c0_i32_1 = arith.constant 0 : i32
    return %arg0, %c0_i32, %c0_i32_0 : i32, i32, i32
  }
  func.func @transform_1(%arg0: i32, %arg1: i32) -> (i32, i32, i32) {
    %c0_i32 = arith.constant 0 : i32
    %c0_i32_0 = arith.constant 0 : i32
    %c0_i32_1 = arith.constant 0 : i32
    %c0_i32_2 = arith.constant 0 : i32
    return %c0_i32, %c0_i32_0, %c0_i32_1 : i32, i32, i32
  }
  func.func @transform_2(%arg0: i32, %arg1: i32) -> (i32, i32, i32) {
    %c0_i32 = arith.constant 0 : i32
    %c0_i32_0 = arith.constant 0 : i32
    return %arg0, %arg1, %c0_i32 : i32, i32, i32
  }
  func.func @transform_3(%arg0: i32, %arg1: i32) -> (i32, i32, i32, i32) {
    %c0_i32 = arith.constant 0 : i32
    %c0_i32_0 = arith.constant 0 : i32
    %c0_i32_1 = arith.constant 0 : i32
    return %arg0, %arg1, %c0_i32, %c0_i32_0 : i32, i32, i32, i32
  }
}

module attributes {stable_mosaic.version = 11 : i64} {
  func.func @bn_relu_kernel(%arg0: i32, %arg1: i32, %arg2: memref<1x256x8xbf16, #tpu.memory_space<vmem>>, %arg3: memref<2x8xf32, #tpu.memory_space<vmem>>, %arg4: memref<1x256x8xf32, #tpu.memory_space<vmem>>) attributes {dimension_semantics = [#tpu.dimension_semantics<parallel>, #tpu.dimension_semantics<parallel>], iteration_bounds = array<i64: 2, 1>, scalar_prefetch = 0 : i64, scratch_operands = 0 : i64, tpu.core_type = #tpu.core_type<tc>, window_params = [{transform_indices = @transform_0, window_bounds = array<i64: 1, 256, 8>}, {pipeline_mode = #tpu.pipeline_mode<synchronous>, transform_indices = @transform_1, window_bounds = array<i64: 2, 8>}, {transform_indices = @transform_2, window_bounds = array<i64: 1, 256, 8>}]} {
    %c0 = arith.constant 0 : index
    %c0_0 = arith.constant 0 : index
    %c0_1 = arith.constant 0 : index
    %0 = vector.load %arg2[%c0, %c0_0, %c0_1] : memref<1x256x8xbf16, #tpu.memory_space<vmem>>, vector<1x256x8xbf16>
    %1 = vector.shape_cast %0 : vector<1x256x8xbf16> to vector<256x8xbf16>
    %2 = arith.extf %1 : vector<256x8xbf16> to vector<256x8xf32>
    %c0_2 = arith.constant 0 : index
    %c0_3 = arith.constant 0 : index
    %3 = vector.load %arg3[%c0_2, %c0_3] : memref<2x8xf32, #tpu.memory_space<vmem>>, vector<1x8xf32>
    %4 = vector.broadcast %3 : vector<1x8xf32> to vector<256x8xf32>
    %5 = arith.mulf %2, %4 : vector<256x8xf32>
    %c1 = arith.constant 1 : index
    %c0_4 = arith.constant 0 : index
    %6 = vector.load %arg3[%c1, %c0_4] : memref<2x8xf32, #tpu.memory_space<vmem>>, vector<1x8xf32>
    %7 = vector.broadcast %6 : vector<1x8xf32> to vector<256x8xf32>
    %8 = arith.addf %5, %7 : vector<256x8xf32>
    %cst = arith.constant 0.000000e+00 : f32
    %9 = vector.broadcast %cst : f32 to vector<256x8xf32>
    %10 = arith.maximumf %8, %9 : vector<256x8xf32>
    %c0_5 = arith.constant 0 : index
    %c0_6 = arith.constant 0 : index
    %c0_7 = arith.constant 0 : index
    %11 = vector.load %arg4[%c0_5, %c0_6, %c0_7] : memref<1x256x8xf32, #tpu.memory_space<vmem>>, vector<1x256x8xf32>
    %12 = vector.shape_cast %11 : vector<1x256x8xf32> to vector<256x8xf32>
    %13 = vector.shape_cast %10 : vector<256x8xf32> to vector<1x256x8xf32>
    tpu.vector_store %arg4[%c0_5, %c0_6, %c0_7], %13 {strides = array<i32>} : memref<1x256x8xf32, #tpu.memory_space<vmem>>, vector<1x256x8xf32>,
    return
  }
  func.func @transform_0(%arg0: i32, %arg1: i32) -> (i32, i32, i32) {
    %c0_i32 = arith.constant 0 : i32
    %c0_i32_0 = arith.constant 0 : i32
    return %arg0, %arg1, %c0_i32 : i32, i32, i32
  }
  func.func @transform_1(%arg0: i32, %arg1: i32) -> (i32, i32) {
    %c0_i32 = arith.constant 0 : i32
    %c0_i32_0 = arith.constant 0 : i32
    %c0_i32_1 = arith.constant 0 : i32
    return %c0_i32, %c0_i32_0 : i32, i32
  }
  func.func @transform_2(%arg0: i32, %arg1: i32) -> (i32, i32, i32) {
    %c0_i32 = arith.constant 0 : i32
    %c0_i32_0 = arith.constant 0 : i32
    return %arg0, %arg1, %c0_i32 : i32, i32, i32
  }
}

</mosaic_0001>

<bundles_post_ra>
// kernel: conv_bn_relu_pallas.3
= control target key start
LH: loop header
LB: loop body
LE: loop exit
PB: predicated region body
PF: predicated region fallthrough
CT: control target
= control target key end

     0   :  { %s630_s9 = smov 0   ;;  %s632_s10 = smov 0   ;;  %s825_s0 = inlined_call_operand.vmem [shape: bf16[2,256,8], index: 0, kind: input, shape index: {}]   ;;  %s826_s1 = inlined_call_operand.vmem [shape: f32[2,8], index: 1, kind: input, shape index: {}]   ;;  %s827_s2 = inlined_call_operand.vmem [shape: f32[2,256,8], index: 2, kind: output, shape index: {}]  }
   0x1   :  { %s634_s11 = smov 0  }
   0x2 LB: > { %s24_s12 = sadd.s32 1, %s609_s10  ;;  %p477_p0 = scmp.ge.s32.totalorder %s613_s11, 1  ;;  %s613_s11 = sphi %s634_s11, %s12_s11   ;;  %s609_s10 = sphi %s632_s10, %s829_s10   ;;  %s605_s9 = sphi %s630_s9, %s828_s9  }
   0x3   : > { %p26_p1 = scmp.ge.s32.totalorder %s24_s12, 2  ;;  %p133_p2 = scmp.lt.s32.totalorder %s613_s11, 3 }
   0x5   : > { %s831_s12 = smov (%p26_p1, %s24_s12), 0  ;;  %p134_p3 = pnand %p477_p0, %p133_p2 }
   0x6   : > { %p164_p4 = scmp.lt.s32.totalorder (!%p134_p3), %s605_s9, 1  ;;  %v659_v0 = vld [vmem:[%s826_s1] ss:$0 sm:$0xff] (!%p134_p3)  ;;  %vm353_vm0 = vcmask (!%p134_p3), 64512   ;;  %v668_v9 = vld [vmem:[%s826_s1 + $0x1] ss:$0 sm:$0xff] (!%p134_p3) }
   0x7   : > { %137 = sbr.rel (%p134_p3) target bundleno = 54 (0x36), region = 28 }
   0xe   : > { %s833_s9 = smov (!%p164_p4, %s605_s9), 1 }
   0xf   : > { %s486_s13 = sshll.u32 %s833_s9, 7  ;;  %s487_s21 = sshll.u32 %s833_s9, 8 }
  0x10   : > { %s654_s16 = scalar_lea.vmem %s825_s0, %s486_s13  ;;  %s686_s24 = scalar_lea.vmem %s827_s2, %s487_s21 }
  0x11   : > { %v489_v1 = vld [vmem:[%s654_s16] sm:$0xff]   ;;  %v552_v2 = vld [vmem:[%s654_s16 + $0x8] sm:$0xff]   ;;  %v553_v3 = vld [vmem:[%s654_s16 + $0x10] sm:$0xff]  }
  0x12   : > { %v490_v4 = vunpack.c.l.bf16 %v489_v1  ;;  %v491_v5 = vunpack.c.h.bf16 %v489_v1  ;;  %v494_v6 = vunpack.c.l.bf16 %v552_v2  ;;  %v495_v7 = vunpack.c.h.bf16 %v552_v2  ;;  %v554_v8 = vld [vmem:[%s654_s16 + $0x18] sm:$0xff]   ;;  %v555_v30 = vld [vmem:[%s654_s16 + $0x20] sm:$0xff]   ;;  %v556_v31 = vld [vmem:[%s654_s16 + $0x28] sm:$0xff]  }
  0x13   : > { %v498_v10 = vunpack.c.l.bf16 %v553_v3  ;;  %v499_v11 = vunpack.c.h.bf16 %v553_v3  ;;  %v502_v12 = vunpack.c.l.bf16 %v554_v8  ;;  %v503_v13 = vunpack.c.h.bf16 %v554_v8  ;;  %v557_v36 = vld [vmem:[%s654_s16 + $0x30] sm:$0xff]   ;;  %v558_v37 = vld [vmem:[%s654_s16 + $0x38] sm:$0xff]   ;;  %v559_v3 = vld [vmem:[%s654_s16 + $0x40] sm:$0xff]  }
  0x14   : > { %v252_v14 = vmul.f32 %v490_v4, %v659_v0  ;;  %v253_v15 = vmul.f32 %v491_v5, %v659_v0  ;;  %v254_v16 = vmul.f32 %v494_v6, %v659_v0  ;;  %v255_v17 = vmul.f32 %v495_v7, %v659_v0  ;;  %v560_v4 = vld [vmem:[%s654_s16 + $0x48] sm:$0xff]  }
  0x15   : > { %v256_v18 = vmul.f32 %v498_v10, %v659_v0  ;;  %v257_v19 = vmul.f32 %v499_v11, %v659_v0  ;;  %v258_v20 = vmul.f32 %v502_v12, %v659_v0  ;;  %v259_v21 = vmul.f32 %v503_v13, %v659_v0  ;;  %v561_v10 = vld [vmem:[%s654_s16 + $0x50] sm:$0xff]   ;;  %v562_v11 = vld [vmem:[%s654_s16 + $0x58] sm:$0xff]  }
  0x16   : > { %v289_v22 = vadd.f32 %v668_v9, %v252_v14  ;;  %v290_v23 = vadd.f32 %v668_v9, %v253_v15  ;;  %v291_v24 = vadd.f32 %v668_v9, %v254_v16  ;;  %v292_v25 = vadd.f32 %v668_v9, %v255_v17 }
  0x17   : > { %v293_v26 = vadd.f32 %v668_v9, %v256_v18  ;;  %v294_v27 = vadd.f32 %v668_v9, %v257_v19  ;;  %v295_v28 = vadd.f32 %v668_v9, %v258_v20  ;;  %v296_v29 = vadd.f32 %v668_v9, %v259_v21 }
  0x18   : > { %v321_v32 = vmax.f32 %v289_v22, 0.0  ;;  %v322_v33 = vmax.f32 %v290_v23, 0.0  ;;  %v323_v34 = vmax.f32 %v291_v24, 0.0  ;;  %v324_v35 = vmax.f32 %v292_v25, 0.0 }
  0x19   : > { %v325_v38 = vmax.f32 %v293_v26, 0.0  ;;  %v326_v39 = vmax.f32 %v294_v27, 0.0  ;;  %v327_v40 = vmax.f32 %v295_v28, 0.0  ;;  %v328_v41 = vmax.f32 %v296_v29, 0.0 }
  0x1a   : > { %354 = vst.msk [vmem:[%s686_s24] sm:$0xff] %vm353_vm0, %v321_v32  ;;  %355 = vst.msk [vmem:[%s686_s24 + $0x8] sm:$0xff] %vm353_vm0, %v322_v33  ;;  %v506_v42 = vunpack.c.l.bf16 %v555_v30  ;;  %v507_v43 = vunpack.c.h.bf16 %v555_v30  ;;  %v510_v44 = vunpack.c.l.bf16 %v556_v31  ;;  %v511_v45 = vunpack.c.h.bf16 %v556_v31 }
  0x1b   : > { %356 = vst.msk [vmem:[%s686_s24 + $0x10] sm:$0xff] %vm353_vm0, %v323_v34  ;;  %357 = vst.msk [vmem:[%s686_s24 + $0x18] sm:$0xff] %vm353_vm0, %v324_v35  ;;  %v514_v46 = vunpack.c.l.bf16 %v557_v36  ;;  %v515_v47 = vunpack.c.h.bf16 %v557_v36  ;;  %v518_v48 = vunpack.c.l.bf16 %v558_v37  ;;  %v519_v49 = vunpack.c.h.bf16 %v558_v37 }
  0x1c   : > { %358 = vst.msk [vmem:[%s686_s24 + $0x20] sm:$0xff] %vm353_vm0, %v325_v38  ;;  %359 = vst.msk [vmem:[%s686_s24 + $0x28] sm:$0xff] %vm353_vm0, %v326_v39  ;;  %v260_v50 = vmul.f32 %v506_v42, %v659_v0  ;;  %v261_v51 = vmul.f32 %v507_v43, %v659_v0  ;;  %v262_v52 = vmul.f32 %v510_v44, %v659_v0  ;;  %v522_v16 = vunpack.c.l.bf16 %v559_v3 }
  0x1d   : > { %360 = vst.msk [vmem:[%s686_s24 + $0x30] sm:$0xff] %vm353_vm0, %v327_v40  ;;  %361 = vst.msk [vmem:[%s686_s24 + $0x38] sm:$0xff] %vm353_vm0, %v328_v41  ;;  %v263_v53 = vmul.f32 %v511_v45, %v659_v0  ;;  %v264_v54 = vmul.f32 %v514_v46, %v659_v0  ;;  %v265_v55 = vmul.f32 %v515_v47, %v659_v0  ;;  %v523_v17 = vunpack.c.h.bf16 %v559_v3  ;;  %v563_v40 = vld [vmem:[%s654_s16 + $0x60] sm:$0xff]   ;;  %v564_v41 = vld [vmem:[%s654_s16 + $0x68] sm:$0xff]  }
  0x1e   : > { %v266_v56 = vmul.f32 %v518_v48, %v659_v0  ;;  %v267_v57 = vmul.f32 %v519_v49, %v659_v0  ;;  %v297_v58 = vadd.f32 %v668_v9, %v260_v50  ;;  %v298_v59 = vadd.f32 %v668_v9, %v261_v51  ;;  %v565_v46 = vld [vmem:[%s654_s16 + $0x70] sm:$0xff]   ;;  %v566_v47 = vld [vmem:[%s654_s16 + $0x78] sm:$0xff]  }
  0x1f   : > { %v299_v60 = vadd.f32 %v668_v9, %v262_v52  ;;  %v300_v61 = vadd.f32 %v668_v9, %v263_v53  ;;  %v301_v62 = vadd.f32 %v668_v9, %v264_v54  ;;  %v302_v63 = vadd.f32 %v668_v9, %v265_v55 }
  0x20   : > { %v303_v1 = vadd.f32 %v668_v9, %v266_v56  ;;  %v304_v2 = vadd.f32 %v668_v9, %v267_v57  ;;  %v329_v5 = vmax.f32 %v297_v58, 0.0  ;;  %v330_v6 = vmax.f32 %v298_v59, 0.0 }
  0x21   : > { %v331_v7 = vmax.f32 %v299_v60, 0.0  ;;  %v332_v8 = vmax.f32 %v300_v61, 0.0  ;;  %v333_v12 = vmax.f32 %v301_v62, 0.0  ;;  %v334_v13 = vmax.f32 %v302_v63, 0.0 }
  0x22   : > { %v335_v14 = vmax.f32 %v303_v1, 0.0  ;;  %v336_v15 = vmax.f32 %v304_v2, 0.0  ;;  %362 = vst.msk [vmem:[%s686_s24 + $0x40] sm:$0xff] %vm353_vm0, %v329_v5  ;;  %363 = vst.msk [vmem:[%s686_s24 + $0x48] sm:$0xff] %vm353_vm0, %v330_v6  ;;  %v526_v18 = vunpack.c.l.bf16 %v560_v4  ;;  %v527_v19 = vunpack.c.h.bf16 %v560_v4 }
  0x23   : > { %364 = vst.msk [vmem:[%s686_s24 + $0x50] sm:$0xff] %vm353_vm0, %v331_v7  ;;  %365 = vst.msk [vmem:[%s686_s24 + $0x58] sm:$0xff] %vm353_vm0, %v332_v8  ;;  %v530_v20 = vunpack.c.l.bf16 %v561_v10  ;;  %v531_v21 = vunpack.c.h.bf16 %v561_v10  ;;  %v534_v22 = vunpack.c.l.bf16 %v562_v11  ;;  %v535_v23 = vunpack.c.h.bf16 %v562_v11 }
  0x24   : > { %366 = vst.msk [vmem:[%s686_s24 + $0x60] sm:$0xff] %vm353_vm0, %v333_v12  ;;  %367 = vst.msk [vmem:[%s686_s24 + $0x68] sm:$0xff] %vm353_vm0, %v334_v13  ;;  %v268_v24 = vmul.f32 %v522_v16, %v659_v0  ;;  %v269_v25 = vmul.f32 %v523_v17, %v659_v0  ;;  %v270_v26 = vmul.f32 %v526_v18, %v659_v0  ;;  %v538_v52 = vunpack.c.l.bf16 %v563_v40 }
  0x25   : > { %368 = vst.msk [vmem:[%s686_s24 + $0x70] sm:$0xff] %vm353_vm0, %v335_v14  ;;  %369 = vst.msk [vmem:[%s686_s24 + $0x78] sm:$0xff] %vm353_vm0, %v336_v15  ;;  %v271_v27 = vmul.f32 %v527_v19, %v659_v0  ;;  %v272_v28 = vmul.f32 %v530_v20, %v659_v0  ;;  %v273_v29 = vmul.f32 %v531_v21, %v659_v0  ;;  %v539_v53 = vunpack.c.h.bf16 %v563_v40 }
  0x26   : > { %v274_v30 = vmul.f32 %v534_v22, %v659_v0  ;;  %v275_v31 = vmul.f32 %v535_v23, %v659_v0  ;;  %v305_v32 = vadd.f32 %v668_v9, %v268_v24  ;;  %v306_v33 = vadd.f32 %v668_v9, %v269_v25 }
  0x27   : > { %v307_v34 = vadd.f32 %v668_v9, %v270_v26  ;;  %v308_v35 = vadd.f32 %v668_v9, %v271_v27  ;;  %v309_v36 = vadd.f32 %v668_v9, %v272_v28  ;;  %v310_v37 = vadd.f32 %v668_v9, %v273_v29 }
  0x28   : > { %v311_v38 = vadd.f32 %v668_v9, %v274_v30  ;;  %v312_v39 = vadd.f32 %v668_v9, %v275_v31  ;;  %v337_v42 = vmax.f32 %v305_v32, 0.0  ;;  %v338_v43 = vmax.f32 %v306_v33, 0.0 }
  0x29   : > { %v339_v44 = vmax.f32 %v307_v34, 0.0  ;;  %v340_v45 = vmax.f32 %v308_v35, 0.0  ;;  %v341_v48 = vmax.f32 %v309_v36, 0.0  ;;  %v342_v49 = vmax.f32 %v310_v37, 0.0 }
  0x2a   : > { %v343_v50 = vmax.f32 %v311_v38, 0.0  ;;  %v344_v51 = vmax.f32 %v312_v39, 0.0  ;;  %370 = vst.msk [vmem:[%s686_s24 + $0x80] sm:$0xff] %vm353_vm0, %v337_v42  ;;  %371 = vst.msk [vmem:[%s686_s24 + $0x88] sm:$0xff] %vm353_vm0, %v338_v43  ;;  %v542_v54 = vunpack.c.l.bf16 %v564_v41  ;;  %v543_v55 = vunpack.c.h.bf16 %v564_v41 }
  0x2b   : > { %372 = vst.msk [vmem:[%s686_s24 + $0x90] sm:$0xff] %vm353_vm0, %v339_v44  ;;  %373 = vst.msk [vmem:[%s686_s24 + $0x98] sm:$0xff] %vm353_vm0, %v340_v45  ;;  %v546_v56 = vunpack.c.l.bf16 %v565_v46  ;;  %v547_v57 = vunpack.c.h.bf16 %v565_v46  ;;  %v550_v58 = vunpack.c.l.bf16 %v566_v47  ;;  %v551_v59 = vunpack.c.h.bf16 %v566_v47 }
  0x2c   : > { %374 = vst.msk [vmem:[%s686_s24 + $0xa0] sm:$0xff] %vm353_vm0, %v341_v48  ;;  %375 = vst.msk [vmem:[%s686_s24 + $0xa8] sm:$0xff] %vm353_vm0, %v342_v49  ;;  %v276_v60 = vmul.f32 %v538_v52, %v659_v0  ;;  %v277_v61 = vmul.f32 %v539_v53, %v659_v0  ;;  %v278_v62 = vmul.f32 %v542_v54, %v659_v0 }
  0x2d   : > { %376 = vst.msk [vmem:[%s686_s24 + $0xb0] sm:$0xff] %vm353_vm0, %v343_v50  ;;  %377 = vst.msk [vmem:[%s686_s24 + $0xb8] sm:$0xff] %vm353_vm0, %v344_v51  ;;  %v279_v63 = vmul.f32 %v543_v55, %v659_v0  ;;  %v280_v1 = vmul.f32 %v546_v56, %v659_v0  ;;  %v281_v2 = vmul.f32 %v547_v57, %v659_v0 }
  0x2e   : > { %v282_v3 = vmul.f32 %v550_v58, %v659_v0  ;;  %v283_v4 = vmul.f32 %v551_v59, %v659_v0  ;;  %v313_v5 = vadd.f32 %v668_v9, %v276_v60  ;;  %v314_v6 = vadd.f32 %v668_v9, %v277_v61 }
  0x2f   : > { %v315_v7 = vadd.f32 %v668_v9, %v278_v62  ;;  %v316_v8 = vadd.f32 %v668_v9, %v279_v63  ;;  %v317_v10 = vadd.f32 %v668_v9, %v280_v1  ;;  %v318_v11 = vadd.f32 %v668_v9, %v281_v2 }
  0x30   : > { %v319_v0 = vadd.f32 %v668_v9, %v282_v3  ;;  %v320_v12 = vadd.f32 %v668_v9, %v283_v4  ;;  %v345_v13 = vmax.f32 %v313_v5, 0.0  ;;  %v346_v14 = vmax.f32 %v314_v6, 0.0 }
  0x31   : > { %v347_v15 = vmax.f32 %v315_v7, 0.0  ;;  %v348_v16 = vmax.f32 %v316_v8, 0.0  ;;  %v349_v17 = vmax.f32 %v317_v10, 0.0  ;;  %v350_v18 = vmax.f32 %v318_v11, 0.0 }
  0x32   : > { %v351_v19 = vmax.f32 %v319_v0, 0.0  ;;  %v352_v20 = vmax.f32 %v320_v12, 0.0  ;;  %378 = vst.msk [vmem:[%s686_s24 + $0xc0] sm:$0xff] %vm353_vm0, %v345_v13  ;;  %379 = vst.msk [vmem:[%s686_s24 + $0xc8] sm:$0xff] %vm353_vm0, %v346_v14 }
  0x33   : > { %380 = vst.msk [vmem:[%s686_s24 + $0xd0] sm:$0xff] %vm353_vm0, %v347_v15  ;;  %381 = vst.msk [vmem:[%s686_s24 + $0xd8] sm:$0xff] %vm353_vm0, %v348_v16 }
  0x34   : > { %382 = vst.msk [vmem:[%s686_s24 + $0xe0] sm:$0xff] %vm353_vm0, %v349_v17  ;;  %383 = vst.msk [vmem:[%s686_s24 + $0xe8] sm:$0xff] %vm353_vm0, %v350_v18 }
  0x35   : > { %384 = vst.msk [vmem:[%s686_s24 + $0xf0] sm:$0xff] %vm353_vm0, %v351_v19  ;;  %385 = vst.msk [vmem:[%s686_s24 + $0xf8] sm:$0xff] %vm353_vm0, %v352_v20 }
  0x36 PF: > { %s12_s11 = sadd.s32 1, %s613_s11   ;;  %s828_s9 = smov %s609_s10 }
  0x37   : > { %p9_p5 = scmp.ge.s32.totalorder %s12_s11, 4   ;;  %s829_s10 = smov %s831_s12 }
  0x39   :  { %11 = sbr.rel (!%p9_p5) target bundleno = 2 (0x2), region = 58 }

// kernel: conv_bn_relu_pallas.2
= control target key start
LH: loop header
LB: loop body
LE: loop exit
PB: predicated region body
PF: predicated region fallthrough
CT: control target
= control target key end

     0   :  { %s2341_s12 = smov 0   ;;  %s2343_s13 = smov 0   ;;  %s2874_s0 = inlined_call_operand.vmem [shape: bf16[2,288,12], index: 0, kind: input, shape index: {}]   ;;  %s2875_s1 = inlined_call_operand.vmem [shape: bf16[3,12,8], index: 1, kind: input, shape index: {}]   ;;  %s2876_s2 = inlined_call_operand.vmem [shape: bf16[2,256,8], index: 2, kind: output, shape index: {0}]   ;;  %s2877_s3 = inlined_call_operand.vmem [shape: f32[2,1,2,8], index: 3, kind: output, shape index: {1}]  }
   0x1   :  { %s2345_s14 = smov 0  }
   0x2 LB: > { %s26_s15 = sadd.s32 1, %s2315_s13  ;;  %p1759_p0 = scmp.ge.s32.totalorder %s2319_s14, 1  ;;  %s2319_s14 = sphi %s2345_s14, %s14_s14   ;;  %s2315_s13 = sphi %s2343_s13, %s2879_s13   ;;  %s2311_s12 = sphi %s2341_s12, %s2878_s12  }
   0x3   : > { %p28_p1 = scmp.ge.s32.totalorder %s26_s15, 2  ;;  %p156_p2 = scmp.lt.s32.totalorder %s2319_s14, 3 }
   0x5   : > { %s2881_s15 = smov (%p28_p1, %s26_s15), 0  ;;  %p157_p3 = pnand %p1759_p0, %p156_p2 }
   0x6   : > { %v2246_v0 = vld [vmem:[%s2875_s1 + $0x8] sm:$0x3f] (!%p157_p3)   ;;  %vm427_vm0 = vcmask (!%p157_p3), 1045504   ;;  %p191_p4 = scmp.lt.s32.totalorder (!%p157_p3), %s2311_s12, 1  ;;  %v2247_v1 = vld [vmem:[%s2875_s1] sm:$0x3f] (!%p157_p3)  }
   0x7   : > { %160 = sbr.rel (%p157_p3) target bundleno = 427 (0x1ab), region = 28  ;;  %2217 = vmatprep.subr.msk.bf16.mxu1 (!%p157_p3), %vm427_vm0, %v2246_v0  ;;  %v429_v2 = vsel (!%p157_p3), %vm427_vm0, %v2246_v0, 0  ;;  %v2250_v3 = vld [vmem:[%s2875_s1 + $0x10] sm:$0x3f] (!%p157_p3)   ;;  %2218 = vmatprep.subr.msk.bf16.mxu0 (!%p157_p3), %vm427_vm0, %v2247_v1  ;;  %v726_v4 = vsel (!%p157_p3), %vm427_vm0, %v2247_v1, 0  ;;  %vm378_vm1 = vcmask (!%p157_p3), 97280  }
   0x8   : > { %2050 = vmatpush3.bf16.msra.mxu1 (!%p157_p3), %v429_v2  ;;  %2084 = vmatpush3.bf16.msra.mxu0 (!%p157_p3), %v726_v4  ;;  %v1063_v9 = vsel (!%p157_p3), %vm427_vm0, %v2250_v3, 0  ;;  %vm1386_vm2 = vcmask (!%p157_p3), 60416   ;;  %vm1419_vm3 = vcmask (!%p157_p3), 64512   ;;  %vm1623_vm4 = vcmask (!%p157_p3), 1040384  }
   0x9   : > { %2219 = vmatprep.subr.msk.bf16.mxu1 (!%p157_p3), %vm427_vm0, %v2247_v1  ;;  %2220 = vmatprep.subr.msk.bf16.mxu0 (!%p157_p3), %vm427_vm0, %v2250_v3  ;;  %vm1625_vm5 = vcmask (!%p157_p3), 58368  }
   0xe   : > { %s2883_s12 = smov (!%p191_p4, %s2311_s12), 1 }
   0xf   : > { %s2221_s22 = smul.u32 144, %s2883_s12  ;;  %s1965_s26 = sshll.u32 %s2883_s12, 7 }
  0x10   : > { %s2497_s29 = scalar_lea.vmem %s2876_s2, %s1965_s26  ;;  %s1763_s30 = sshll.u32 %s2883_s12, 1 }
  0x11   : > { %s2380_s25 = scalar_lea.vmem %s2874_s0, %s2221_s22  ;;  %s212_s6 = scalar_lea.vmem %s2877_s3, %s1763_s30 }
  0x12   : > { %v2248_v5 = vld [vmem:[%s2380_s25 + $0x8] sm:$0xff]   ;;  %v2249_v6 = vld [vmem:[%s2380_s25] sm:$0xff]   ;;  %v2251_v7 = vld [vmem:[%s2380_s25 + $0x10] sm:$0xff]  }
  0x13   : > { %2051 = vmatprep.mubr.msk.bf16.mxu1 %vm378_vm1, %v2248_v5  ;;  %2085 = vmatprep.mubr.msk.bf16.mxu0 %vm378_vm1, %v2249_v6  ;;  %v2252_v8 = vld [vmem:[%s2380_s25 + $0x8] sm:$0xff]   ;;  %v2253_v10 = vld [vmem:[%s2380_s25 + $0x18] sm:$0xff]   ;;  %v2254_v11 = vld [vmem:[%s2380_s25 + $0x10] sm:$0xff]  }
  0x14   : > { %2052 = vmatmul.mubr.msk.bf16.vlgmr.msra.gmra.mrb[0].mxu1 %vm378_vm1, %v2251_v7  ;;  %2086 = vmatmul.mubr.msk.bf16.vlgmr.msra.gmra.mrb[0].mxu0 %vm378_vm1, %v2252_v8  ;;  %v2255_v12 = vld [vmem:[%s2380_s25 + $0x20] sm:$0xff]   ;;  %v2256_v13 = vld [vmem:[%s2380_s25 + $0x18] sm:$0xff]   ;;  %v2257_v14 = vld [vmem:[%s2380_s25 + $0x28] sm:$0xff]  }
  0x15   : > { %2152 = vmatpush3.bf16.msra.mxu1 %v726_v4  ;;  %2118 = vmatpush3.bf16.msra.mxu0 %v1063_v9  ;;  %v2258_v15 = vld [vmem:[%s2380_s25 + $0x20] sm:$0xff]   ;;  %v2259_v16 = vld [vmem:[%s2380_s25 + $0x30] sm:$0xff]   ;;  %v2260_v17 = vld [vmem:[%s2380_s25 + $0x28] sm:$0xff]  }
  0x16   : > { %2055 = vmatprep.mubr.msk.bf16.mxu1 %vm378_vm1, %v2253_v10  ;;  %2089 = vmatprep.mubr.msk.bf16.mxu0 %vm378_vm1, %v2254_v11  ;;  %v2261_v18 = vld [vmem:[%s2380_s25 + $0x38] sm:$0xff]   ;;  %v2262_v19 = vld [vmem:[%s2380_s25 + $0x30] sm:$0xff]   ;;  %v2263_v20 = vld [vmem:[%s2380_s25 + $0x40] sm:$0xff]  }
  0x17   : > { %v2264_v21 = vld [vmem:[%s2380_s25 + $0x38] sm:$0xff]   ;;  %v2265_v22 = vld [vmem:[%s2380_s25 + $0x48] sm:$0xff]   ;;  %v2266_v23 = vld [vmem:[%s2380_s25 + $0x10] sm:$0xff]  }
  0x18   : > { %v2267_v24 = vld [vmem:[%s2380_s25 + $0x50] sm:$0xff]   ;;  %v2268_v25 = vld [vmem:[%s2380_s25 + $0x18] sm:$0xff]   ;;  %v2270_v27 = vld [vmem:[%s2380_s25 + $0x20] sm:$0xff]  }
  0x19   : > { %v2269_v26 = vld [vmem:[%s2380_s25 + $0x58] sm:$0xff]   ;;  %v2271_v28 = vld [vmem:[%s2380_s25 + $0x60] sm:$0xff]   ;;  %v2272_v29 = vld [vmem:[%s2380_s25 + $0x28] sm:$0xff]  }
  0x1a   : > { %v2273_v30 = vld [vmem:[%s2380_s25 + $0x68] sm:$0xff]   ;;  %v2274_v31 = vld [vmem:[%s2380_s25 + $0x30] sm:$0xff]   ;;  %v2276_v33 = vld [vmem:[%s2380_s25 + $0x38] sm:$0xff]  }
  0x1b   : > { %v2275_v32 = vld [vmem:[%s2380_s25 + $0x70] sm:$0xff]   ;;  %v2277_v34 = vld [vmem:[%s2380_s25 + $0x78] sm:$0xff]   ;;  %v2278_v35 = vld [vmem:[%s2380_s25 + $0x40] sm:$0xff]  }
  0x1c   : > { %2056 = vmatmul.mubr.msk.bf16.gmra.mrb[4].mxu1 %vm378_vm1, %v2255_v12  ;;  %2090 = vmatmul.mubr.msk.bf16.gmra.mrb[4].mxu0 %vm378_vm1, %v2256_v13  ;;  %v2279_v36 = vld [vmem:[%s2380_s25 + $0x80] sm:$0xff]   ;;  %v2280_v37 = vld [vmem:[%s2380_s25 + $0x48] sm:$0xff]   ;;  %v2282_v39 = vld [vmem:[%s2380_s25 + $0x50] sm:$0xff]  }
  0x1d   : > { %2059 = vmatprep.mubr.msk.bf16.mxu1 %vm378_vm1, %v2257_v14  ;;  %2093 = vmatprep.mubr.msk.bf16.mxu0 %vm378_vm1, %v2258_v15  ;;  %v2281_v38 = vld [vmem:[%s2380_s25 + $0x40] sm:$0xff]   ;;  %v2283_v40 = vld [vmem:[%s2380_s25 + $0x48] sm:$0xff]   ;;  %v2284_v41 = vld [vmem:[%s2380_s25 + $0x58] sm:$0xff]  }
  0x1e   : > { %v2285_v42 = vld [vmem:[%s2380_s25 + $0x50] sm:$0xff]   ;;  %v2286_v43 = vld [vmem:[%s2380_s25 + $0x60] sm:$0xff]   ;;  %v2287_v44 = vld [vmem:[%s2380_s25 + $0x58] sm:$0xff]  }
  0x1f   : > { %v2288_v45 = vld [vmem:[%s2380_s25 + $0x68] sm:$0xff]   ;;  %v2289_v46 = vld [vmem:[%s2380_s25 + $0x60] sm:$0xff]   ;;  %v2290_v47 = vld [vmem:[%s2380_s25 + $0x70] sm:$0xff]  }
  0x20   : > { %v2291_v48 = vld [vmem:[%s2380_s25 + $0x68] sm:$0xff]   ;;  %v2292_v49 = vld [vmem:[%s2380_s25 + $0x78] sm:$0xff]   ;;  %v2293_v50 = vld [vmem:[%s2380_s25 + $0x70] sm:$0xff]  }
  0x21   : > { %v2294_v51 = vld [vmem:[%s2380_s25 + $0x80] sm:$0xff]   ;;  %v2295_v52 = vld [vmem:[%s2380_s25 + $0x78] sm:$0xff]   ;;  %v2296_v53 = vld [vmem:[%s2380_s25 + $0x88] sm:$0xff]  }
  0x24   : > { %2060 = vmatmul.mubr.msk.bf16.gmra.mrb[8].mxu1 %vm378_vm1, %v2259_v16  ;;  %2094 = vmatmul.mubr.msk.bf16.gmra.mrb[8].mxu0 %vm378_vm1, %v2260_v17 }
  0x25   : > { %2063 = vmatprep.mubr.msk.bf16.mxu1 %vm378_vm1, %v2261_v18  ;;  %2097 = vmatprep.mubr.msk.bf16.mxu0 %vm378_vm1, %v2262_v19 }
  0x2c   : > { %2064 = vmatmul.mubr.msk.bf16.gmra.mrb[12].mxu1 %vm378_vm1, %v2263_v20  ;;  %2098 = vmatmul.mubr.msk.bf16.gmra.mrb[12].mxu0 %vm378_vm1, %v2264_v21 }
  0x2d   : > { %2067 = vmatprep.mubr.msk.bf16.mxu1 %vm378_vm1, %v2265_v22  ;;  %2119 = vmatprep.mubr.msk.bf16.mxu0 %vm378_vm1, %v2266_v23 }
  0x34   : > { %2068 = vmatmul.mubr.msk.bf16.gmra.mrb[16].mxu1 %vm378_vm1, %v2267_v24  ;;  %2120 = vmatmul.mubr.msk.bf16.vlgmr.msra.gmra.mrb[0].mxu0 %vm378_vm1, %v2268_v25 }
  0x35   : > { %2071 = vmatprep.mubr.msk.bf16.mxu1 %vm378_vm1, %v2269_v26  ;;  %2123 = vmatprep.mubr.msk.bf16.mxu0 %vm378_vm1, %v2270_v27 }
  0x3c   : > { %2072 = vmatmul.mubr.msk.bf16.gmra.mrb[20].mxu1 %vm378_vm1, %v2271_v28  ;;  %2124 = vmatmul.mubr.msk.bf16.gmra.mrb[4].mxu0 %vm378_vm1, %v2272_v29 }
  0x3d   : > { %2075 = vmatprep.mubr.msk.bf16.mxu1 %vm378_vm1, %v2273_v30  ;;  %2127 = vmatprep.mubr.msk.bf16.mxu0 %vm378_vm1, %v2274_v31 }
  0x44   : > { %2076 = vmatmul.mubr.msk.bf16.gmra.mrb[24].mxu1 %vm378_vm1, %v2275_v32  ;;  %2128 = vmatmul.mubr.msk.bf16.gmra.mrb[8].mxu0 %vm378_vm1, %v2276_v33 }
  0x45   : > { %2079 = vmatprep.mubr.msk.bf16.mxu1 %vm378_vm1, %v2277_v34  ;;  %2131 = vmatprep.mubr.msk.bf16.mxu0 %vm378_vm1, %v2278_v35 }
  0x4c   : > { %2080 = vmatmul.mubr.msk.bf16.gmra.mrb[28].mxu1 %vm378_vm1, %v2279_v36  ;;  %2132 = vmatmul.mubr.msk.bf16.gmra.mrb[12].mxu0 %vm378_vm1, %v2280_v37 }
  0x4d   : > { %2101 = vmatprep.mubr.msk.bf16.mxu1 %vm378_vm1, %v2281_v38  ;;  %2135 = vmatprep.mubr.msk.bf16.mxu0 %vm378_vm1, %v2282_v39 }
  0x54   : > { %2102 = vmatmul.mubr.msk.bf16.vlgmr.msra.gmra.mrb[16].mxu1 %vm378_vm1, %v2283_v40  ;;  %2136 = vmatmul.mubr.msk.bf16.gmra.mrb[16].mxu0 %vm378_vm1, %v2284_v41 }
  0x55   : > { %2105 = vmatprep.mubr.msk.bf16.mxu1 %vm378_vm1, %v2285_v42  ;;  %2139 = vmatprep.mubr.msk.bf16.mxu0 %vm378_vm1, %v2286_v43 }
  0x5c   : > { %2106 = vmatmul.mubr.msk.bf16.gmra.mrb[20].mxu1 %vm378_vm1, %v2287_v44  ;;  %2140 = vmatmul.mubr.msk.bf16.gmra.mrb[20].mxu0 %vm378_vm1, %v2288_v45 }
  0x5d   : > { %2109 = vmatprep.mubr.msk.bf16.mxu1 %vm378_vm1, %v2289_v46  ;;  %2143 = vmatprep.mubr.msk.bf16.mxu0 %vm378_vm1, %v2290_v47 }
  0x64   : > { %2110 = vmatmul.mubr.msk.bf16.gmra.mrb[24].mxu1 %vm378_vm1, %v2291_v48  ;;  %2144 = vmatmul.mubr.msk.bf16.gmra.mrb[24].mxu0 %vm378_vm1, %v2292_v49 }
  0x65   : > { %2113 = vmatprep.mubr.msk.bf16.mxu1 %vm378_vm1, %v2293_v50  ;;  %2147 = vmatprep.mubr.msk.bf16.mxu0 %vm378_vm1, %v2294_v51 }
  0x6c   : > { %2114 = vmatmul.mubr.msk.bf16.gmra.mrb[28].mxu1 %vm378_vm1, %v2295_v52  ;;  %2148 = vmatmul.mubr.msk.bf16.gmra.mrb[28].mxu0 %vm378_vm1, %v2296_v53 }
  0xe7   : > { %v2053_v54 = vpop.f32.mrb[0].mxu1 }
  0xe8   : > { %v465_v55 = vpop.f32.mrb[1].mxu1 }
  0xe9   : > { %v2054_v56 = vpop.f32.mrb[2].mxu1 }
  0xea   : > { %v468_v57 = vpop.f32.mrb[3].mxu1 }
  0xef   : > { %v2057_v58 = vpop.f32.mrb[4].mxu1 }
  0xf0   : > { %v481_v59 = vpop.f32.mrb[5].mxu1 }
  0xf1   : > { %v2058_v60 = vpop.f32.mrb[6].mxu1 }
  0xf2   : > { %v484_v61 = vpop.f32.mrb[7].mxu1 }
  0xf7   : > { %v2061_v62 = vpop.f32.mrb[8].mxu1 }
  0xf8   : > { %v497_v63 = vpop.f32.mrb[9].mxu1 }
  0xf9   : > { %v2479_v0 = vpop.f32.mrb[10].mxu1 }
  0xfa   : > { %v2481_v1 = vpop.f32.mrb[11].mxu1 }
  0xff   : > { %v2483_v2 = vpop.f32.mrb[12].mxu1 }
 0x100   : > { %v2485_v3 = vpop.f32.mrb[13].mxu1 }
 0x101   : > { %v2487_v4 = vpop.f32.mrb[14].mxu1 }
 0x102   : > { %v2489_v5 = vpop.f32.mrb[15].mxu1 }
 0x107   : > { %v2121_v6 = vpop.f32.mrb[0].mxu0 }
 0x108   : > { %v2492_v7 = vadd.f32 %v2121_v6, %v2053_v54  ;;  %v1099_v8 = vpop.f32.mrb[1].mxu0 }
 0x109   : > { %v2499_v9 = vadd.f32 %v1099_v8, %v465_v55  ;;  %v2122_v10 = vpop.f32.mrb[2].mxu0 }
 0x10a   : > { %v1968_v11 = vpack.c.bf16 %v2492_v7, %v2492_v7  ;;  %v2503_v12 = vadd.f32 %v2122_v10, %v2054_v56  ;;  %v1102_v13 = vpop.f32.mrb[3].mxu0  ;;  %v1423_v21 = vsel %vm1419_vm3, %v2492_v7, 0.0 }
 0x10b   : > { %v1966_v14 = vpack.c.bf16 %v2499_v9, %v2499_v9  ;;  %v2507_v15 = vadd.f32 %v1102_v13, %v468_v57  ;;  %v1420_v17 = vsel %vm1419_vm3, %v2499_v9, 0.0 }
 0x10c   : > { %1389 = vst.msk [vmem:[%s2497_s29 + $0x8] sm:$0xf] %vm1386_vm2, %v1968_v11  ;;  %v1969_v16 = vpack.c.bf16 %v2503_v12, %v2503_v12  ;;  %v1425_v26 = vsel %vm1419_vm3, %v2503_v12, 0.0 }
 0x10d   : > { %1387 = vst.msk [vmem:[%s2497_s29] sm:$0xf] %vm1386_vm2, %v1966_v14  ;;  %v1967_v18 = vpack.c.bf16 %v2507_v15, %v2507_v15  ;;  %v1421_v19 = vsel %vm1419_vm3, %v2507_v15, 0.0 }
 0x10e   : > { %1390 = vst.msk [vmem:[%s2497_s29 + $0xc] sm:$0xf] %vm1386_vm2, %v1969_v16  ;;  %v1422_v20 = vadd.f32 %v1421_v19, %v1420_v17 }
 0x10f   : > { %1388 = vst.msk [vmem:[%s2497_s29 + $0x4] sm:$0xf] %vm1386_vm2, %v1967_v18  ;;  %v2125_v22 = vpop.f32.mrb[4].mxu0 }
 0x110   : > { %v1424_v23 = vadd.f32 %v1423_v21, %v1422_v20  ;;  %v2527_v24 = vadd.f32 %v2125_v22, %v2057_v58  ;;  %v1115_v25 = vpop.f32.mrb[5].mxu0 }
 0x111   : > { %v2531_v27 = vadd.f32 %v1115_v25, %v481_v59  ;;  %v2126_v28 = vpop.f32.mrb[6].mxu0 }
 0x112   : > { %v1972_v29 = vpack.c.bf16 %v2527_v24, %v2527_v24  ;;  %v1426_v30 = vadd.f32 %v1425_v26, %v1424_v23  ;;  %v2535_v31 = vadd.f32 %v2126_v28, %v2058_v60  ;;  %v1118_v32 = vpop.f32.mrb[7].mxu0  ;;  %v1431_v41 = vsel %vm1419_vm3, %v2527_v24, 0.0 }
 0x113   : > { %v1970_v33 = vpack.c.bf16 %v2531_v27, %v2531_v27  ;;  %v1427_v34 = vsel %vm1419_vm3, %v2531_v27, 0.0  ;;  %v2541_v35 = vadd.f32 %v1118_v32, %v484_v61 }
 0x114   : > { %1393 = vst.msk [vmem:[%s2497_s29 + $0x18] sm:$0xf] %vm1386_vm2, %v1972_v29  ;;  %v1428_v36 = vadd.f32 %v1427_v34, %v1426_v30  ;;  %v1973_v37 = vpack.c.bf16 %v2535_v31, %v2535_v31  ;;  %v1433_v46 = vsel %vm1419_vm3, %v2535_v31, 0.0 }
 0x115   : > { %1391 = vst.msk [vmem:[%s2497_s29 + $0x10] sm:$0xf] %vm1386_vm2, %v1970_v33  ;;  %v1971_v38 = vpack.c.bf16 %v2541_v35, %v2541_v35  ;;  %v1429_v39 = vsel %vm1419_vm3, %v2541_v35, 0.0 }
 0x116   : > { %1394 = vst.msk [vmem:[%s2497_s29 + $0x1c] sm:$0xf] %vm1386_vm2, %v1973_v37  ;;  %v1430_v40 = vadd.f32 %v1429_v39, %v1428_v36 }
 0x117   : > { %1392 = vst.msk [vmem:[%s2497_s29 + $0x14] sm:$0xf] %vm1386_vm2, %v1971_v38  ;;  %v2129_v42 = vpop.f32.mrb[8].mxu0 }
 0x118   : > { %v1432_v43 = vadd.f32 %v1431_v41, %v1430_v40  ;;  %v2559_v44 = vadd.f32 %v2129_v42, %v2061_v62  ;;  %v1131_v45 = vpop.f32.mrb[9].mxu0 }
 0x119   : > { %v2563_v47 = vadd.f32 %v1131_v45, %v497_v63  ;;  %v2130_v48 = vpop.f32.mrb[10].mxu0 }
 0x11a   : > { %v1976_v49 = vpack.c.bf16 %v2559_v44, %v2559_v44  ;;  %v1434_v50 = vadd.f32 %v1433_v46, %v1432_v43  ;;  %v2568_v51 = vadd.f32 %v2130_v48, %v2479_v0  ;;  %v1134_v52 = vpop.f32.mrb[11].mxu0  ;;  %v1439_v61 = vsel %vm1419_vm3, %v2559_v44, 0.0 }
 0x11b   : > { %v1974_v53 = vpack.c.bf16 %v2563_v47, %v2563_v47  ;;  %v1435_v54 = vsel %vm1419_vm3, %v2563_v47, 0.0  ;;  %v2575_v55 = vadd.f32 %v1134_v52, %v2481_v1 }
 0x11c   : > { %1397 = vst.msk [vmem:[%s2497_s29 + $0x28] sm:$0xf] %vm1386_vm2, %v1976_v49  ;;  %v1436_v56 = vadd.f32 %v1435_v54, %v1434_v50  ;;  %v1977_v57 = vpack.c.bf16 %v2568_v51, %v2568_v51  ;;  %v1441_v6 = vsel %vm1419_vm3, %v2568_v51, 0.0 }
 0x11d   : > { %1395 = vst.msk [vmem:[%s2497_s29 + $0x20] sm:$0xf] %vm1386_vm2, %v1974_v53  ;;  %v1975_v58 = vpack.c.bf16 %v2575_v55, %v2575_v55  ;;  %v1437_v59 = vsel %vm1419_vm3, %v2575_v55, 0.0 }
 0x11e   : > { %1398 = vst.msk [vmem:[%s2497_s29 + $0x2c] sm:$0xf] %vm1386_vm2, %v1977_v57  ;;  %v1438_v60 = vadd.f32 %v1437_v59, %v1436_v56 }
 0x11f   : > { %1396 = vst.msk [vmem:[%s2497_s29 + $0x24] sm:$0xf] %vm1386_vm2, %v1975_v58  ;;  %v2133_v62 = vpop.f32.mrb[12].mxu0 }
 0x120   : > { %v1440_v63 = vadd.f32 %v1439_v61, %v1438_v60  ;;  %v2594_v0 = vadd.f32 %v2133_v62, %v2483_v2  ;;  %v1147_v1 = vpop.f32.mrb[13].mxu0 }
 0x121   : > { %v2599_v8 = vadd.f32 %v1147_v1, %v2485_v3  ;;  %v2134_v10 = vpop.f32.mrb[14].mxu0 }
 0x122   : > { %v1980_v11 = vpack.c.bf16 %v2594_v0, %v2594_v0  ;;  %v1442_v13 = vadd.f32 %v1441_v6, %v1440_v63  ;;  %v2604_v14 = vadd.f32 %v2134_v10, %v2487_v4  ;;  %v1150_v16 = vpop.f32.mrb[15].mxu0 }
 0x123   : > { %v1978_v2 = vpack.c.bf16 %v2599_v8, %v2599_v8  ;;  %v1443_v17 = vsel %vm1419_vm3, %v2599_v8, 0.0  ;;  %v2611_v18 = vadd.f32 %v1150_v16, %v2489_v5  ;;  %v1447_v5 = vsel %vm1419_vm3, %v2594_v0, 0.0 }
 0x124   : > { %1401 = vst.msk [vmem:[%s2497_s29 + $0x38] sm:$0xf] %vm1386_vm2, %v1980_v11  ;;  %v1444_v3 = vadd.f32 %v1443_v17, %v1442_v13  ;;  %v1981_v19 = vpack.c.bf16 %v2604_v14, %v2604_v14  ;;  %v1449_v32 = vsel %vm1419_vm3, %v2604_v14, 0.0 }
 0x125   : > { %1399 = vst.msk [vmem:[%s2497_s29 + $0x30] sm:$0xf] %vm1386_vm2, %v1978_v2  ;;  %v1979_v4 = vpack.c.bf16 %v2611_v18, %v2611_v18  ;;  %v1445_v20 = vsel %vm1419_vm3, %v2611_v18, 0.0 }
 0x126   : > { %1402 = vst.msk [vmem:[%s2497_s29 + $0x3c] sm:$0xf] %vm1386_vm2, %v1981_v19  ;;  %v1446_v21 = vadd.f32 %v1445_v20, %v1444_v3 }
 0x127   : > { %v2103_v22 = vpop.f32.mrb[16].mxu1  ;;  %1400 = vst.msk [vmem:[%s2497_s29 + $0x34] sm:$0xf] %vm1386_vm2, %v1979_v4  ;;  %v2137_v23 = vpop.f32.mrb[16].mxu0 }
 0x128   : > { %v826_v25 = vpop.f32.mrb[17].mxu1  ;;  %v1448_v26 = vadd.f32 %v1447_v5, %v1446_v21  ;;  %v2629_v28 = vadd.f32 %v2137_v23, %v2103_v22  ;;  %v1163_v29 = vpop.f32.mrb[17].mxu0 }
 0x129   : > { %v2104_v30 = vpop.f32.mrb[18].mxu1  ;;  %v2633_v33 = vadd.f32 %v1163_v29, %v826_v25  ;;  %v2138_v34 = vpop.f32.mrb[18].mxu0 }
 0x12a   : > { %v829_v36 = vpop.f32.mrb[19].mxu1  ;;  %v1984_v37 = vpack.c.bf16 %v2629_v28, %v2629_v28  ;;  %v1450_v38 = vadd.f32 %v1449_v32, %v1448_v26  ;;  %v2637_v39 = vadd.f32 %v2138_v34, %v2104_v30  ;;  %v1166_v40 = vpop.f32.mrb[19].mxu0  ;;  %v1455_v53 = vsel %vm1419_vm3, %v2629_v28, 0.0 }
 0x12b   : > { %v1982_v41 = vpack.c.bf16 %v2633_v33, %v2633_v33  ;;  %v1451_v42 = vsel %vm1419_vm3, %v2633_v33, 0.0  ;;  %v2643_v43 = vadd.f32 %v1166_v40, %v829_v36 }
 0x12c   : > { %1405 = vst.msk [vmem:[%s2497_s29 + $0x48] sm:$0xf] %vm1386_vm2, %v1984_v37  ;;  %v1452_v45 = vadd.f32 %v1451_v42, %v1450_v38  ;;  %v1985_v46 = vpack.c.bf16 %v2637_v39, %v2637_v39  ;;  %v1457_v61 = vsel %vm1419_vm3, %v2637_v39, 0.0 }
 0x12d   : > { %1403 = vst.msk [vmem:[%s2497_s29 + $0x40] sm:$0xf] %vm1386_vm2, %v1982_v41  ;;  %v1983_v48 = vpack.c.bf16 %v2643_v43, %v2643_v43  ;;  %v1453_v49 = vsel %vm1419_vm3, %v2643_v43, 0.0 }
 0x12e   : > { %1406 = vst.msk [vmem:[%s2497_s29 + $0x4c] sm:$0xf] %vm1386_vm2, %v1985_v46  ;;  %v1454_v50 = vadd.f32 %v1453_v49, %v1452_v45 }
 0x12f   : > { %v2107_v52 = vpop.f32.mrb[20].mxu1  ;;  %1404 = vst.msk [vmem:[%s2497_s29 + $0x44] sm:$0xf] %vm1386_vm2, %v1983_v48  ;;  %v2141_v54 = vpop.f32.mrb[20].mxu0 }
 0x130   : > { %v842_v56 = vpop.f32.mrb[21].mxu1  ;;  %v1456_v57 = vadd.f32 %v1455_v53, %v1454_v50  ;;  %v2661_v58 = vadd.f32 %v2141_v54, %v2107_v52  ;;  %v1179_v59 = vpop.f32.mrb[21].mxu0 }
 0x131   : > { %v2108_v60 = vpop.f32.mrb[22].mxu1  ;;  %v2665_v62 = vadd.f32 %v1179_v59, %v842_v56  ;;  %v2142_v63 = vpop.f32.mrb[22].mxu0 }
 0x132   : > { %v845_v1 = vpop.f32.mrb[23].mxu1  ;;  %v1988_v6 = vpack.c.bf16 %v2661_v58, %v2661_v58  ;;  %v1458_v10 = vadd.f32 %v1457_v61, %v1456_v57  ;;  %v2669_v11 = vadd.f32 %v2142_v63, %v2108_v60  ;;  %v1182_v13 = vpop.f32.mrb[23].mxu0  ;;  %v1463_v5 = vsel %vm1419_vm3, %v2661_v58, 0.0 }
 0x133   : > { %v1986_v16 = vpack.c.bf16 %v2665_v62, %v2665_v62  ;;  %v1459_v2 = vsel %vm1419_vm3, %v2665_v62, 0.0  ;;  %v2675_v17 = vadd.f32 %v1182_v13, %v845_v1 }
 0x134   : > { %1409 = vst.msk [vmem:[%s2497_s29 + $0x58] sm:$0xf] %vm1386_vm2, %v1988_v6  ;;  %v1460_v3 = vadd.f32 %v1459_v2, %v1458_v10  ;;  %v1989_v19 = vpack.c.bf16 %v2669_v11, %v2669_v11  ;;  %v1465_v34 = vsel %vm1419_vm3, %v2669_v11, 0.0 }
 0x135   : > { %1407 = vst.msk [vmem:[%s2497_s29 + $0x50] sm:$0xf] %vm1386_vm2, %v1986_v16  ;;  %v1987_v4 = vpack.c.bf16 %v2675_v17, %v2675_v17  ;;  %v1461_v20 = vsel %vm1419_vm3, %v2675_v17, 0.0 }
 0x136   : > { %1410 = vst.msk [vmem:[%s2497_s29 + $0x5c] sm:$0xf] %vm1386_vm2, %v1989_v19  ;;  %v1462_v21 = vadd.f32 %v1461_v20, %v1460_v3 }
 0x137   : > { %v2111_v22 = vpop.f32.mrb[24].mxu1  ;;  %1408 = vst.msk [vmem:[%s2497_s29 + $0x54] sm:$0xf] %vm1386_vm2, %v1987_v4  ;;  %v2145_v23 = vpop.f32.mrb[24].mxu0 }
 0x138   : > { %v858_v25 = vpop.f32.mrb[25].mxu1  ;;  %v1464_v26 = vadd.f32 %v1463_v5, %v1462_v21  ;;  %v2693_v29 = vadd.f32 %v2145_v23, %v2111_v22  ;;  %v1195_v30 = vpop.f32.mrb[25].mxu0 }
 0x139   : > { %v2112_v32 = vpop.f32.mrb[26].mxu1  ;;  %v2697_v36 = vadd.f32 %v1195_v30, %v858_v25  ;;  %v2146_v37 = vpop.f32.mrb[26].mxu0 }
 0x13a   : > { %v861_v38 = vpop.f32.mrb[27].mxu1  ;;  %v1992_v40 = vpack.c.bf16 %v2693_v29, %v2693_v29  ;;  %v1466_v41 = vadd.f32 %v1465_v34, %v1464_v26  ;;  %v2701_v42 = vadd.f32 %v2146_v37, %v2112_v32  ;;  %v1198_v45 = vpop.f32.mrb[27].mxu0  ;;  %v1471_v59 = vsel %vm1419_vm3, %v2693_v29, 0.0 }
 0x13b   : > { %v1990_v46 = vpack.c.bf16 %v2697_v36, %v2697_v36  ;;  %v1467_v48 = vsel %vm1419_vm3, %v2697_v36, 0.0  ;;  %v2707_v49 = vadd.f32 %v1198_v45, %v861_v38 }
 0x13c   : > { %1413 = vst.msk [vmem:[%s2497_s29 + $0x68] sm:$0xf] %vm1386_vm2, %v1992_v40  ;;  %v1468_v50 = vadd.f32 %v1467_v48, %v1466_v41  ;;  %v1993_v52 = vpack.c.bf16 %v2701_v42, %v2701_v42  ;;  %v1473_v13 = vsel %vm1419_vm3, %v2701_v42, 0.0 }
 0x13d   : > { %1411 = vst.msk [vmem:[%s2497_s29 + $0x60] sm:$0xf] %vm1386_vm2, %v1990_v46  ;;  %v1991_v53 = vpack.c.bf16 %v2707_v49, %v2707_v49  ;;  %v1469_v54 = vsel %vm1419_vm3, %v2707_v49, 0.0 }
 0x13e   : > { %1414 = vst.msk [vmem:[%s2497_s29 + $0x6c] sm:$0xf] %vm1386_vm2, %v1993_v52  ;;  %v1470_v56 = vadd.f32 %v1469_v54, %v1468_v50 }
 0x13f   : > { %v2115_v57 = vpop.f32.mrb[28].mxu1  ;;  %1412 = vst.msk [vmem:[%s2497_s29 + $0x64] sm:$0xf] %vm1386_vm2, %v1991_v53  ;;  %v2149_v60 = vpop.f32.mrb[28].mxu0 }
 0x140   : > { %v874_v61 = vpop.f32.mrb[29].mxu1  ;;  %v1472_v63 = vadd.f32 %v1471_v59, %v1470_v56  ;;  %v2725_v1 = vadd.f32 %v2149_v60, %v2115_v57  ;;  %v1211_v6 = vpop.f32.mrb[29].mxu0 }
 0x141   : > { %v2116_v10 = vpop.f32.mrb[30].mxu1  ;;  %v2729_v16 = vadd.f32 %v1211_v6, %v874_v61  ;;  %v2150_v2 = vpop.f32.mrb[30].mxu0 }
 0x142   : > { %v877_v3 = vpop.f32.mrb[31].mxu1  ;;  %v1996_v19 = vpack.c.bf16 %v2725_v1, %v2725_v1  ;;  %v1474_v4 = vadd.f32 %v1473_v13, %v1472_v63  ;;  %v2733_v20 = vadd.f32 %v2150_v2, %v2116_v10  ;;  %v1214_v21 = vpop.f32.mrb[31].mxu0  ;;  %v1479_v37 = vsel %vm1419_vm3, %v2725_v1, 0.0 }
 0x143   : > { %v1994_v22 = vpack.c.bf16 %v2729_v16, %v2729_v16  ;;  %v1475_v5 = vsel %vm1419_vm3, %v2729_v16, 0.0  ;;  %v2739_v23 = vadd.f32 %v1214_v21, %v877_v3 }
 0x144   : > { %1417 = vst.msk [vmem:[%s2497_s29 + $0x78] sm:$0xf] %vm1386_vm2, %v1996_v19  ;;  %v1476_v25 = vadd.f32 %v1475_v5, %v1474_v4  ;;  %v1997_v26 = vpack.c.bf16 %v2733_v20, %v2733_v20  ;;  %v1481_v40 = vsel %vm1419_vm3, %v2733_v20, 0.0 }
 0x145   : > { %1415 = vst.msk [vmem:[%s2497_s29 + $0x70] sm:$0xf] %vm1386_vm2, %v1994_v22  ;;  %v1995_v30 = vpack.c.bf16 %v2739_v23, %v2739_v23  ;;  %v1477_v32 = vsel %vm1419_vm3, %v2739_v23, 0.0 }
 0x146   : > { %1418 = vst.msk [vmem:[%s2497_s29 + $0x7c] sm:$0xf] %vm1386_vm2, %v1997_v26  ;;  %v1478_v34 = vadd.f32 %v1477_v32, %v1476_v25 }
 0x147   : > { %1416 = vst.msk [vmem:[%s2497_s29 + $0x74] sm:$0xf] %vm1386_vm2, %v1995_v30 }
 0x148   : > { %v1480_v38 = vadd.f32 %v1479_v37, %v1478_v34 }
 0x14a   : > { %v1482_v41 = vadd.f32 %v1481_v40, %v1480_v38 }
 0x14c   : > { %v1483_v45 = vrot.slane %v1482_v41, 4 }
 0x14e   : > { %v1484_v46 = vadd.f32 %v1483_v45, %v1482_v41 }
 0x150   : > { %v1485_v48 = vrot.slane %v1484_v46, 2 }
 0x152   : > { %v1486_v50 = vadd.f32 %v1485_v48, %v1484_v46 }
 0x154   : > { %v1487_v52 = vrot.slane %v1486_v50, 1 }
 0x156   : > { %v2759_v53 = vadd.f32 %v1487_v52, %v1486_v50 }
 0x158   : > { %v2762_v54 = vmul.f32 0.00390625, %v2759_v53 }
 0x15a   : > { %v1490_v56 = vsub.f32 %v2499_v9, %v2762_v54  ;;  %v1491_v57 = vsub.f32 %v2507_v15, %v2762_v54  ;;  %v1492_v59 = vsub.f32 %v2492_v7, %v2762_v54  ;;  %v1493_v60 = vsub.f32 %v2503_v12, %v2762_v54 }
 0x15b   : > { %v1494_v6 = vsub.f32 %v2531_v27, %v2762_v54  ;;  %v1495_v13 = vsub.f32 %v2541_v35, %v2762_v54  ;;  %v1496_v7 = vsub.f32 %v2527_v24, %v2762_v54  ;;  %v1497_v27 = vsub.f32 %v2535_v31, %v2762_v54 }
 0x15c   : > { %v1522_v61 = vmul.f32 %v1490_v56, %v1490_v56  ;;  %v1523_v63 = vmul.f32 %v1491_v57, %v1491_v57  ;;  %v1524_v10 = vmul.f32 %v1492_v59, %v1492_v59  ;;  %v1525_v2 = vmul.f32 %v1493_v60, %v1493_v60 }
 0x15d   : > { %v1526_v19 = vmul.f32 %v1494_v6, %v1494_v6  ;;  %v1527_v21 = vmul.f32 %v1495_v13, %v1495_v13  ;;  %v1498_v5 = vsub.f32 %v2563_v47, %v2762_v54  ;;  %v1528_v25 = vmul.f32 %v1496_v7, %v1496_v7 }
 0x15e   : > { %v1554_v9 = vsel %vm1419_vm3, %v1522_v61, 0.0  ;;  %v1555_v15 = vsel %vm1419_vm3, %v1523_v63, 0.0  ;;  %v1557_v12 = vsel %vm1419_vm3, %v1524_v10, 0.0  ;;  %v1559_v22 = vsel %vm1419_vm3, %v1525_v2, 0.0 }
 0x15f   : > { %v1556_v3 = vadd.f32 %v1555_v15, %v1554_v9  ;;  %v1561_v26 = vsel %vm1419_vm3, %v1526_v19, 0.0  ;;  %v1499_v24 = vsub.f32 %v2575_v55, %v2762_v54  ;;  %v1529_v32 = vmul.f32 %v1497_v27, %v1497_v27 }
 0x160   : > { %v1563_v34 = vsel %vm1419_vm3, %v1527_v21, 0.0  ;;  %v1500_v31 = vsub.f32 %v2559_v44, %v2762_v54  ;;  %v1530_v38 = vmul.f32 %v1498_v5, %v1498_v5  ;;  %v1565_v40 = vsel %vm1419_vm3, %v1528_v25, 0.0 }
 0x161   : > { %v1558_v4 = vadd.f32 %v1557_v12, %v1556_v3  ;;  %v1501_v47 = vsub.f32 %v2568_v51, %v2762_v54  ;;  %v1531_v45 = vmul.f32 %v1499_v24, %v1499_v24  ;;  %v1567_v46 = vsel %vm1419_vm3, %v1529_v32, 0.0 }
 0x162   : > { %v1502_v55 = vsub.f32 %v2599_v8, %v2762_v54  ;;  %v1532_v50 = vmul.f32 %v1500_v31, %v1500_v31  ;;  %v1569_v52 = vsel %vm1419_vm3, %v1530_v38, 0.0  ;;  %v1503_v44 = vsub.f32 %v2611_v18, %v2762_v54 }
 0x163   : > { %v1560_v35 = vadd.f32 %v1559_v22, %v1558_v4  ;;  %v1533_v57 = vmul.f32 %v1501_v47, %v1501_v47  ;;  %v1571_v59 = vsel %vm1419_vm3, %v1531_v45, 0.0  ;;  %v1504_v51 = vsub.f32 %v2594_v0, %v2762_v54 }
 0x164   : > { %v1534_v61 = vmul.f32 %v1502_v55, %v1502_v55  ;;  %v1573_v63 = vsel %vm1419_vm3, %v1532_v50, 0.0  ;;  %v1505_v8 = vsub.f32 %v2604_v14, %v2762_v54  ;;  %v1535_v10 = vmul.f32 %v1503_v44, %v1503_v44 }
 0x165   : > { %v1562_v30 = vadd.f32 %v1561_v26, %v1560_v35  ;;  %v1575_v13 = vsel %vm1419_vm3, %v1533_v57, 0.0  ;;  %v1506_v18 = vsub.f32 %v2633_v33, %v2762_v54  ;;  %v1536_v9 = vmul.f32 %v1504_v51, %v1504_v51 }
 0x166   : > { %v1577_v15 = vsel %vm1419_vm3, %v1534_v61, 0.0  ;;  %v1507_v0 = vsub.f32 %v2643_v43, %v2762_v54  ;;  %v1537_v7 = vmul.f32 %v1505_v8, %v1505_v8  ;;  %v1579_v19 = vsel %vm1419_vm3, %v1535_v10, 0.0 }
 0x167   : > { %v1564_v37 = vadd.f32 %v1563_v34, %v1562_v30  ;;  %v1508_v14 = vsub.f32 %v2629_v28, %v2762_v54  ;;  %v1538_v4 = vmul.f32 %v1506_v18, %v1506_v18  ;;  %v1581_v27 = vsel %vm1419_vm3, %v1536_v9, 0.0 }
 0x168   : > { %v1509_v33 = vsub.f32 %v2637_v39, %v2762_v54  ;;  %v1539_v22 = vmul.f32 %v1507_v0, %v1507_v0  ;;  %v1583_v35 = vsel %vm1419_vm3, %v1537_v7, 0.0  ;;  %v1510_v43 = vsub.f32 %v2665_v62, %v2762_v54 }
 0x169   : > { %v1566_v41 = vadd.f32 %v1565_v40, %v1564_v37  ;;  %v1540_v25 = vmul.f32 %v1508_v14, %v1508_v14  ;;  %v1585_v26 = vsel %vm1419_vm3, %v1538_v4, 0.0  ;;  %v1511_v28 = vsub.f32 %v2675_v17, %v2762_v54 }
 0x16a   : > { %v1541_v24 = vmul.f32 %v1509_v33, %v1509_v33  ;;  %v1587_v32 = vsel %vm1419_vm3, %v1539_v22, 0.0  ;;  %v1512_v39 = vsub.f32 %v2661_v58, %v2762_v54  ;;  %v1542_v37 = vmul.f32 %v1510_v43, %v1510_v43 }
 0x16b   : > { %v1568_v48 = vadd.f32 %v1567_v46, %v1566_v41  ;;  %v1589_v31 = vsel %vm1419_vm3, %v1540_v25, 0.0  ;;  %v1513_v62 = vsub.f32 %v2669_v11, %v2762_v54  ;;  %v1543_v40 = vmul.f32 %v1511_v28, %v1511_v28 }
 0x16c   : > { %v1591_v41 = vsel %vm1419_vm3, %v1541_v24, 0.0  ;;  %v1514_v17 = vsub.f32 %v2697_v36, %v2762_v54  ;;  %v1544_v45 = vmul.f32 %v1512_v39, %v1512_v39  ;;  %v1593_v46 = vsel %vm1419_vm3, %v1542_v37, 0.0 }
 0x16d   : > { %v1570_v56 = vadd.f32 %v1569_v52, %v1568_v48  ;;  %v1515_v58 = vsub.f32 %v2707_v49, %v2762_v54  ;;  %v1545_v55 = vmul.f32 %v1513_v62, %v1513_v62  ;;  %v1595_v50 = vsel %vm1419_vm3, %v1543_v40, 0.0 }
 0x16e   : > { %v1516_v11 = vsub.f32 %v2693_v29, %v2762_v54  ;;  %v1597_v44 = vsel %vm1419_vm3, %v1544_v45, 0.0  ;;  %v1517_v36 = vsub.f32 %v2701_v42, %v2762_v54  ;;  %v1518_v49 = vsub.f32 %v2729_v16, %v2762_v54 }
 0x16f   : > { %v1572_v60 = vadd.f32 %v1571_v59, %v1570_v56  ;;  %v1546_v56 = vmul.f32 %v1514_v17, %v1514_v17  ;;  %v1547_v59 = vmul.f32 %v1515_v58, %v1515_v58  ;;  %v1519_v29 = vsub.f32 %v2739_v23, %v2762_v54 }
 0x170   : > { %v1548_v61 = vmul.f32 %v1516_v11, %v1516_v11  ;;  %v1549_v8 = vmul.f32 %v1517_v36, %v1517_v36  ;;  %v1520_v42 = vsub.f32 %v2725_v1, %v2762_v54  ;;  %v1521_v16 = vsub.f32 %v2733_v20, %v2762_v54 }
 0x171   : > { %v1574_v6 = vadd.f32 %v1573_v63, %v1572_v60  ;;  %v1599_v60 = vsel %vm1419_vm3, %v1545_v55, 0.0  ;;  %v1601_v63 = vsel %vm1419_vm3, %v1546_v56, 0.0  ;;  %v1603_v10 = vsel %vm1419_vm3, %v1547_v59, 0.0 }
 0x172   : > { %v1605_v18 = vsel %vm1419_vm3, %v1548_v61, 0.0  ;;  %v1552_v23 = vmul.f32 %v1520_v42, %v1520_v42 }
 0x173   : > { %v1576_v2 = vadd.f32 %v1575_v13, %v1574_v6 }
 0x174   : > { %v1613_v4 = vsel %vm1419_vm3, %v1552_v23, 0.0 }
 0x175   : > { %v1578_v3 = vadd.f32 %v1577_v15, %v1576_v2  ;;  %v1550_v2 = vmul.f32 %v1518_v49, %v1518_v49  ;;  %v1551_v15 = vmul.f32 %v1519_v29, %v1519_v29 }
 0x177   : > { %v1580_v12 = vadd.f32 %v1579_v19, %v1578_v3  ;;  %v1607_v3 = vsel %vm1419_vm3, %v1549_v8, 0.0  ;;  %v1609_v7 = vsel %vm1419_vm3, %v1550_v2, 0.0  ;;  %v1611_v14 = vsel %vm1419_vm3, %v1551_v15, 0.0 }
 0x179   : > { %v1582_v21 = vadd.f32 %v1581_v27, %v1580_v12  ;;  %v1553_v12 = vmul.f32 %v1521_v16, %v1521_v16 }
 0x17b   : > { %v1584_v5 = vadd.f32 %v1583_v35, %v1582_v21  ;;  %v1615_v21 = vsel %vm1419_vm3, %v1553_v12, 0.0 }
 0x17d   : > { %v1586_v30 = vadd.f32 %v1585_v26, %v1584_v5 }
 0x17f   : > { %v1588_v34 = vadd.f32 %v1587_v32, %v1586_v30 }
 0x181   : > { %v1590_v38 = vadd.f32 %v1589_v31, %v1588_v34 }
 0x183   : > { %v1592_v47 = vadd.f32 %v1591_v41, %v1590_v38 }
 0x185   : > { %v1594_v48 = vadd.f32 %v1593_v46, %v1592_v47 }
 0x187   : > { %v1596_v52 = vadd.f32 %v1595_v50, %v1594_v48 }
 0x189   : > { %v1598_v57 = vadd.f32 %v1597_v44, %v1596_v52 }
 0x18b   : > { %v1600_v51 = vadd.f32 %v1599_v60, %v1598_v57 }
 0x18d   : > { %v1602_v6 = vadd.f32 %v1601_v63, %v1600_v51 }
 0x18f   : > { %v1604_v13 = vadd.f32 %v1603_v10, %v1602_v6 }
 0x191   : > { %v1606_v9 = vadd.f32 %v1605_v18, %v1604_v13 }
 0x193   : > { %v1608_v0 = vadd.f32 %v1607_v3, %v1606_v9 }
 0x195   : > { %v1610_v19 = vadd.f32 %v1609_v7, %v1608_v0 }
 0x197   : > { %v1612_v1 = vadd.f32 %v1611_v14, %v1610_v19 }
 0x199   : > { %v1614_v27 = vadd.f32 %v1613_v4, %v1612_v1 }
 0x19b   : > { %v1616_v33 = vadd.f32 %v1615_v21, %v1614_v27 }
 0x19d   : > { %v1617_v20 = vrot.slane %v1616_v33, 4 }
 0x19f   : > { %v1618_v54 = vadd.f32 %v1617_v20, %v1616_v33 }
 0x1a1   : > { %v1619_v22 = vrot.slane %v1618_v54, 2 }
 0x1a3   : > { %v1620_v35 = vadd.f32 %v1619_v22, %v1618_v54 }
 0x1a5   : > { %v1621_v5 = vrot.slane %v1620_v35, 1 }
 0x1a7   : > { %v1622_v43 = vadd.f32 %v1621_v5, %v1620_v35 }
 0x1a9   : > { %v1624_v25 = vsel %vm1623_vm4, %v2759_v53, %v1622_v43 }
 0x1aa   : > { %1626 = vst.msk [vmem:[%s212_s6] sm:$0x3] %vm1625_vm5, %v1624_v25 }
 0x1ab PF: > { %s14_s14 = sadd.s32 1, %s2319_s14   ;;  %s2878_s12 = smov %s2315_s13 }
 0x1ac   : > { %p11_p5 = scmp.ge.s32.totalorder %s14_s14, 4   ;;  %s2879_s13 = smov %s2881_s15 }
 0x1ae   :  { %13 = sbr.rel (!%p11_p5) target bundleno = 2 (0x2), region = 75 }

</bundles_post_ra>
